<compile_context>
chip_gen: v5e
topology: v5e:2x2
jax: 0.10.0
libtpu: 0.0.40
codegen_flags: <defaults>
</compile_context>

<pallas_src>
import numpy as np
import jax
import jax.numpy as jnp
from jax.experimental import pallas as pl
from jax.experimental.pallas import tpu as pltpu


def _pe_kernel(coef_ref, out_ref):
    """One (tile_rows, lane_w) tile of the lane-dense encoding slab.

    coef_ref is a resident (3, lane_w) block:
      row 0: freq  = fold * inv_freq(col)
      row 1: bias  = (lane // d_model) * inv_freq(col)
      row 2: odd   = 1.0 for odd table columns (cos lanes), else 0.0
    Slab row R, lane l encodes table position R*fold + l//d_model,
    column l % d_model.
    """
    tile_rows, lane_w = out_ref.shape
    row0 = pl.program_id(0) * tile_rows

    ri = jax.lax.broadcasted_iota(jnp.int32, (tile_rows, lane_w), 0) + row0
    row = ri.astype(jnp.float32)

    freq = coef_ref[0:1, :]
    bias = coef_ref[1:2, :]
    odd = coef_ref[2:3, :] > 0.5

    angle = row * freq + bias
    out_ref[...] = jnp.where(odd, jnp.cos(angle), jnp.sin(angle)).astype(out_ref.dtype)


def make_positional_encoding_table(max_length: int, d_model: int,
                                   dtype=jnp.float32) -> jax.Array:
    """Builds the full (max_length, d_model) sinusoidal table on TPU."""
    assert d_model % 2 == 0, "d_model must be even (same as the PyTorch module)"

    # Lane-dense layout.
    if d_model % 128 == 0:
        fold, lane_w, padded = 1, d_model, False
    elif 128 % d_model == 0:
        # Pack `fold` consecutive positions per 128-wide slab row.
        fold, lane_w, padded = 128 // d_model, 128, False
    else:
        # Pad lane width up to a multiple of 128 -> full-lane vst, slice later.
        fold, lane_w, padded = 1, -(-d_model // 128) * 128, True

    rows_needed = -(-max_length // fold)

    # Row tile: ~8 MiB per output buffer (double-buffered -> ~16 MiB, safe on
    # every generation with an explicit vmem_limit_bytes), but force >= 2 grid
    # steps when there is enough work so both v7x TensorCores participate.
    budget_bytes = 8 * 1024 * 1024
    tile_rows = max(8, (budget_bytes // (lane_w * 4)) // 8 * 8)
    if rows_needed >= 16:
        half_rows = -(-(-(-rows_needed // 2)) // 8) * 8   # round_up(ceil(n/2), 8)
        tile_rows = min(tile_rows, half_rows)
    else:
        tile_rows = max(8, -(-rows_needed // 8) * 8)      # tiny table: 1 step
    grid_steps = -(-rows_needed // tile_rows)
    slab_rows = grid_steps * tile_rows

    # Packed per-lane coefficients (host-built, tiny, resident in VMEM).
    lane = np.arange(lane_w)
    col = lane % d_model
    two_i = (col // 2) * 2
    inv_freq = np.power(10000.0, -(two_i / float(d_model)))
    freq = (float(fold) * inv_freq).astype(np.float32)
    bias = ((lane // d_model) * inv_freq).astype(np.float32)
    odd = (col % 2).astype(np.float32)
    coef = np.stack([freq, bias, odd], axis=0)            # (3, lane_w)

    coef_spec = pl.BlockSpec((3, lane_w), lambda i: (0, 0))  # same block every step

    slab = pl.pallas_call(
        _pe_kernel,
        out_shape=jax.ShapeDtypeStruct((slab_rows, lane_w), dtype),
        grid=(grid_steps,),
        in_specs=[coef_spec],
        out_specs=pl.BlockSpec((tile_rows, lane_w), lambda i: (i, 0)),
        compiler_params=pltpu.CompilerParams(
            dimension_semantics=("parallel",),
            vmem_limit_bytes=32 * 1024 * 1024),
    )(jnp.asarray(coef))

    if padded:
        return slab[:max_length, :d_model]
    return slab.reshape(slab_rows * fold, d_model)[:max_length]


class PositionalEncoding:
    """JAX/Pallas port of the PyTorch PositionalEncoding module."""

    def __init__(self, max_length: int, d_model: int):
        self.max_length = max_length
        self.d_model = d_model
        self.encoding = make_positional_encoding_table(max_length, d_model)

    def __call__(self, embedding: jax.Array) -> jax.Array:
        _, seq_len, _ = embedding.shape
        return self.encoding[:seq_len, :]


def _reference_table(max_length: int, d_model: int) -> jnp.ndarray:
    """Plain-JAX reference mirroring the PyTorch __init__ exactly."""
    enc = jnp.zeros((max_length, d_model), jnp.float32)
    pos = jnp.arange(max_length, dtype=jnp.float32)[:, None]
    two_i = jnp.arange(0, d_model, 2, dtype=jnp.float32)
    arg = pos / (10000.0 ** (two_i / d_model))
    enc = enc.at[:, 0::2].set(jnp.sin(arg))
    enc = enc.at[:, 1::2].set(jnp.cos(arg))
    return enc


if __name__ == "__main__":
    max_length, d_model = 64, 32
    batch, seq_len = 2, 8

    key = jax.random.PRNGKey(0)
    embedding = jax.random.normal(key, (batch, seq_len, d_model), dtype=jnp.float32)

    module = PositionalEncoding(max_length=max_length, d_model=d_model)
    table = jax.block_until_ready(module.encoding)
    out = jax.block_until_ready(module(embedding))

    assert table.shape == (max_length, d_model)
    assert out.shape == (seq_len, d_model)
    assert out.dtype == jnp.float32

    ref_table = _reference_table(max_length, d_model)
    assert jnp.allclose(table, ref_table, atol=1e-4, rtol=1e-4)
    assert jnp.allclose(out, ref_table[:seq_len, :], atol=1e-4, rtol=1e-4)

    print("KERNEL_OK")
</pallas_src>

<mosaic_0001>
module attributes {stable_mosaic.version = 11 : i64} {
  func.func @_pe_kernel(%arg0: i32, %arg1: memref<3x128xf32, #tpu.memory_space<vmem>>, %arg2: memref<8x128xf32, #tpu.memory_space<vmem>>) attributes {dimension_semantics = [#tpu.dimension_semantics<parallel>], iteration_bounds = array<i64: 2>, scalar_prefetch = 0 : i64, scratch_operands = 0 : i64, tpu.core_type = #tpu.core_type<tc>, window_params = [{pipeline_mode = #tpu.pipeline_mode<synchronous>, transform_indices = @transform_0, window_bounds = array<i64: 3, 128>}, {transform_indices = @transform_1, window_bounds = array<i64: 8, 128>}]} {
    %c8_i32 = arith.constant 8 : i32
    %0 = arith.muli %arg0, %c8_i32 : i32
    %1 = tpu.iota {dimensions = array<i32: 0>} : vector<8x128xi32>
    %2 = vector.broadcast %0 : i32 to vector<8x128xi32>
    %3 = arith.addi %1, %2 : vector<8x128xi32>
    %4 = arith.sitofp %3 : vector<8x128xi32> to vector<8x128xf32>
    %c0 = arith.constant 0 : index
    %c0_0 = arith.constant 0 : index
    %5 = vector.load %arg1[%c0, %c0_0] : memref<3x128xf32, #tpu.memory_space<vmem>>, vector<1x128xf32>
    %c1 = arith.constant 1 : index
    %c0_1 = arith.constant 0 : index
    %6 = vector.load %arg1[%c1, %c0_1] : memref<3x128xf32, #tpu.memory_space<vmem>>, vector<1x128xf32>
    %c2 = arith.constant 2 : index
    %c0_2 = arith.constant 0 : index
    %7 = vector.load %arg1[%c2, %c0_2] : memref<3x128xf32, #tpu.memory_space<vmem>>, vector<1x128xf32>
    %cst = arith.constant 5.000000e-01 : f32
    %8 = vector.broadcast %cst : f32 to vector<1x128xf32>
    %9 = arith.cmpf ogt, %7, %8 : vector<1x128xf32>
    %10 = vector.broadcast %5 : vector<1x128xf32> to vector<8x128xf32>
    %11 = arith.mulf %4, %10 : vector<8x128xf32>
    %12 = vector.broadcast %6 : vector<1x128xf32> to vector<8x128xf32>
    %13 = arith.addf %11, %12 : vector<8x128xf32>
    %14 = math.cos %13 : vector<8x128xf32>
    %15 = math.sin %13 : vector<8x128xf32>
    %16 = vector.shape_cast %9 : vector<1x128xi1> to vector<1x128xi1>
    %17 = vector.broadcast %16 : vector<1x128xi1> to vector<8x128xi1>
    %18 = arith.select %17, %14, %15 : vector<8x128xi1>, vector<8x128xf32>
    %c0_3 = arith.constant 0 : index
    %c0_4 = arith.constant 0 : index
    %19 = vector.load %arg2[%c0_3, %c0_4] : memref<8x128xf32, #tpu.memory_space<vmem>>, vector<8x128xf32>
    tpu.vector_store %arg2[%c0_3, %c0_4], %18 {strides = array<i32>} : memref<8x128xf32, #tpu.memory_space<vmem>>, vector<8x128xf32>,
    return
  }
  func.func @transform_0(%arg0: i32) -> (i32, i32) {
    %c0_i32 = arith.constant 0 : i32
    %c0_i32_0 = arith.constant 0 : i32
    %c0_i32_1 = arith.constant 0 : i32
    return %c0_i32, %c0_i32_0 : i32, i32
  }
  func.func @transform_1(%arg0: i32) -> (i32, i32) {
    %c0_i32 = arith.constant 0 : i32
    %c0_i32_0 = arith.constant 0 : i32
    return %arg0, %c0_i32 : i32, i32
  }
}

</mosaic_0001>

<bundles_post_ra>
// kernel: tpu_custom_call.1
= control target key start
LH: loop header
LB: loop body
LE: loop exit
PB: predicated region body
PF: predicated region fallthrough
CT: control target
= control target key end

     0   :  { %6 = vsyncpa [#allocation3], 0  ;;  %s851_s0 = inlined_call_operand.hbm [shape: f32[3,128], index: 0, kind: input, shape index: {}]   ;;  %s852_s1 = inlined_call_operand.hbm [shape: f32[16,128], index: 1, kind: output, shape index: {}]  }
   0x1   :  { %7 = vsyncpa [#allocation4], 0 }
   0x2   :  { %9 = vsyncpa [#allocation4 + $0x1], 0  ;;  %s705_s6 = smov 0   ;;  %s707_s7 = smov 0  }
   0x3   :  { %s709_s8 = smov 0   ;;  %s711_s9 = smov 0  }
   0x4 LB: > { %s726_s10 = sadd.s32 4294967295, %s685_s9   ;;  %s513_s11 = sadd.s32 4294967294, %s685_s9   ;;  %s685_s9 = sphi %s711_s9, %s858_s9   ;;  %s681_s8 = sphi %s709_s8, %s857_s8   ;;  %s677_s7 = sphi %s707_s7, %s856_s7   ;;  %s673_s6 = sphi %s705_s6, %s855_s6  }
   0x5   : > { %s730_s12 = sadd.s32 1, %s685_s9   ;;  %s43_s13 = sadd.s32 1, %s681_s8 }
   0x6   : > { %s40_s14 = ssub.s32 %s685_s9, %s730_s12  ;;  %p53_p0 = scmp.ne.s32.totalorder %s681_s8, %s677_s7 }
   0x7   : > { %p41_p1 = scmp.eq.s32.totalorder %s40_s14, 0  ;;  %p54_p2 = scmp.eq.s32.totalorder %s726_s10, 1 }
   0x8   : > { %p59_p3 = scmp.ne.s32.totalorder %s677_s7, %s673_s6  ;;  %p60_p4 = scmp.eq.s32.totalorder %s513_s11, 1 }
   0x9   : > { %s741_s15 = scalar_select %p41_p1, %s681_s8, %s43_s13  }
   0xa   : > { %p743_p5 = por %p54_p2, %p53_p0  ;;  %p747_p6 = por %p60_p4, %p59_p3 }
   0xb   : > { %p514_p7 = scmp.ge.s32.totalorder %s685_s9, 1  ;;  %p67_p8 = scmp.lt.s32.totalorder %s685_s9, 3 }
   0xc   : > { %p544_p9 = scmp.eq.s32.totalorder %s726_s10, 0  ;;  %s79_s20 = sshll.u32 %s851_s0, 4  ;;  %s80_s20 = int_to_ptr.hbm [resolvable:$true] %s79_s20 }
   0xd   : > { %p68_p10 = pnand %p514_p7, %p67_p8  ;;  %s687_s21 = smov [#allocation2]  }
   0xe   : > { %s81_s22 = sshll.u32 %s687_s21, 4  ;;  %s82_s22 = int_to_ptr.vmem [resolvable:$true] %s81_s22 }
   0xf   : > { %p536_p11 = pneg %p68_p10  ;;  %94 = sbr.rel (%p68_p10) target bundleno = 133 (0x85), region = 24 }
  0x11   : > { %p537_p12 = pnand %p544_p9, %p536_p11 }
  0x13   : > { %539 = dma.hbm_to_vmem [thread:$0]  (!%p537_p12), %s80_s20, 64, %s82_s22, [#allocation3]  }
  0x14   : > { %664 = dma.done.wait (%p544_p9), [#allocation3], 64  }
  0x15   : > { %666 = vsyncadd (%p544_p9), [#allocation3], 4294967232  ;;  %s519_s23 = sshll.u32 %s726_s10, 3  ;;  %v111_v0 = vlaneseq  ;;  %v587_v5 = vld [vmem:[#allocation2] ss:$0 sm:$0xff]  ;;  %s107_s24 = sand.u32 1, %s677_s7  }
  0x16   : > { %v113_v1 = vstv %s519_s23  ;;  %v588_v6 = vld [vmem:[#allocation2 + $0x1] ss:$0 sm:$0xff]  ;;  %v688_v20 = vmov 683565275   ;;  %v689_v22 = vmov 2475754826   ;;  %s449_s28 = scalar_lea.hbm %s852_s1, %s519_s23 }
  0x17   : > { %v112_v2 = vshrl.u32 %v111_v0, 7  ;;  %v690_v24 = vmov 2131351028   ;;  %v691_v26 = vmov 2102212464   ;;  %s812_s25 = sshll.u32 %s107_s24, 3 }
  0x18   : > { %v692_v28 = vmov 920167782   ;;  %v693_v34 = vmov 1326507024   ;;  %s109_s29 = scalar_lea.vmem [#allocation5], %s812_s25  ;;  %s453_s2 = sshll.u32 %s449_s28, 4  ;;  %s454_s2 = int_to_ptr.hbm [resolvable:$true] %s453_s2 }
  0x19   : > { %v114_v3 = vadd.s32 %v113_v1, %v112_v2  ;;  %s451_s30 = sshll.u32 %s109_s29, 4  ;;  %s439_s3 = scalar_lea.sflag [#allocation4], %s107_s24  ;;  %s452_s30 = int_to_ptr.vmem [resolvable:$true] %s451_s30 }
  0x1a   : > { %s633_s4 = sshra.s32 %s454_s2, 4  ;;  %s639_s13 = scalar_lea.hbm %s852_s1, 16  ;;  %s634_s4 = int_to_ptr.hbm [resolvable:$true] %s633_s4 }
  0x1b   : > { %v115_v4 = vcvt.s32.f32 %v114_v3  ;;  %s635_s5 = scalar_lea.hbm %s634_s4, 8  ;;  %p640_p2 = scmp.lt.s32.totalorder %s634_s4, %s852_s1 }
  0x1c   : > { %p636_p13 = scmp.ne.s32.totalorder %s634_s4, %s635_s5  ;;  %p641_p3 = scmp.lt.s32.totalorder %s639_s13, %s635_s5 }
  0x1d   : > { %v121_v7 = vmul.f32 %v587_v5, %v115_v4 }
  0x1e   : > { %p637_p0 = pnand %p636_p13, %p743_p5  ;;  %p642_p4 = por %p641_p3, %p640_p2 }
  0x1f   : > { %v760_v8 = vadd.f32 %v588_v6, %v121_v7 }
  0x20   : > { %p638_p1 = pneg %p637_p0 }
  0x21   : > { %v127_v9 = vand.u32 2139095040, %v760_v8  ;;  %v124_v11 = vand.u32 2147483647, %v760_v8  ;;  %vm126_vm12 = vcmp.lt.s32.totalorder %v760_v8, 0 }
  0x22   : > { %p643_p7 = pnand %p642_p4, %p638_p1 }
  0x23   : > { %v128_v10 = vshrl.u32 %v127_v9, 23  ;;  %v131_v14 = vand.u32 8388607, %v124_v11  ;;  %v694_v9 = vmov 0   ;;  %vm125_vm13 = vcmp.le.f32.partialorder %v124_v11, 0.7853982 }
  0x25   : > { %v520_v12 = vadd.s32 4294967169, %v128_v10  ;;  %v132_v17 = vor.u32 8388608, %v131_v14 }
  0x27   : > { %v134_v13 = vadd.s32 1, %v520_v12  ;;  %v769_v36 = vshll.u32 %v132_v17, 8 }
  0x29   : > { %vm135_vm0 = vcmp.gt.s32.totalorder %v134_v13, 0  ;;  %v173_v48 = vand.u32 65535, %v769_v36  ;;  %v174_v49 = vshrl.u32 %v769_v36, 16 }
  0x2a   : > { %v136_v15 = vsel %vm135_vm0, %v134_v13, 0 }
  0x2b   : > { %v138_v16 = vand.u32 31, %v136_v15  ;;  %v766_v18 = vshrl.u32 %v136_v15, 5 }
  0x2d   : > { %v139_v19 = vsub.s32 32, %v138_v16  ;;  %v141_v21 = vshll.u32 %v688_v20, %v138_v16  ;;  %v144_v23 = vshll.u32 %v689_v22, %v138_v16  ;;  %v147_v25 = vshll.u32 %v690_v24, %v138_v16 }
  0x2e   : > { %v150_v27 = vshll.u32 %v691_v26, %v138_v16  ;;  %v153_v29 = vshll.u32 %v692_v28, %v138_v16  ;;  %vm156_vm1 = vcmp.lt.s32.totalorder %v766_v18, 1  ;;  %vm159_vm2 = vcmp.lt.s32.totalorder %v766_v18, 4 }
  0x2f   : > { %v142_v30 = vshrl.u32 %v689_v22, %v139_v19  ;;  %v145_v31 = vshrl.u32 %v690_v24, %v139_v19  ;;  %v148_v32 = vshrl.u32 %v691_v26, %v139_v19  ;;  %v151_v33 = vshrl.u32 %v692_v28, %v139_v19 }
  0x30   : > { %v154_v35 = vshrl.u32 %v693_v34, %v139_v19  ;;  %vm158_vm3 = vcmp.lt.s32.totalorder %v766_v18, 3  ;;  %vm157_vm4 = vcmp.lt.s32.totalorder %v766_v18, 2  ;;  %v140_v56 = vshrl.u32 %v688_v20, %v139_v19 }
  0x31   : > { %v143_v37 = vor.u32 %v142_v30, %v141_v21  ;;  %v146_v38 = vor.u32 %v145_v31, %v144_v23  ;;  %v149_v39 = vor.u32 %v148_v32, %v147_v25  ;;  %v152_v40 = vor.u32 %v151_v33, %v150_v27 }
  0x32   : > { %v155_v41 = vor.u32 %v154_v35, %v153_v29 }
  0x33   : > { %v164_v42 = vsel %vm156_vm1, %v143_v37, %v146_v38  ;;  %v168_v43 = vsel %vm156_vm1, %v146_v38, %v149_v39  ;;  %v165_v44 = vsel %vm159_vm2, %v152_v40, 920167782  ;;  %v160_v5 = vsel %vm156_vm1, %v140_v56, %v143_v37 }
  0x34   : > { %v169_v45 = vsel %vm159_vm2, %v155_v41, 1326507024  ;;  %v166_v46 = vsel %vm158_vm3, %v149_v39, %v165_v44  ;;  %v161_v7 = vsel %vm159_vm2, %v149_v39, 2102212464 }
  0x35   : > { %v170_v47 = vsel %vm158_vm3, %v152_v40, %v169_v45  ;;  %v167_v50 = vsel %vm157_vm4, %v164_v42, %v166_v46  ;;  %v162_v20 = vsel %vm158_vm3, %v146_v38, %v161_v7 }
  0x36   : > { %v171_v51 = vsel %vm157_vm4, %v168_v43, %v170_v47  ;;  %v197_v54 = vand.u32 65535, %v167_v50  ;;  %v198_v55 = vshrl.u32 %v167_v50, 16  ;;  %v163_v28 = vsel %vm157_vm4, %v160_v5, %v162_v20 }
  0x37   : > { %v175_v52 = vand.u32 65535, %v171_v51  ;;  %v176_v53 = vshrl.u32 %v171_v51, 16  ;;  %v217_v32 = vmul.u32 %v769_v36, %v163_v28 }
  0x38   : > { %v199_v60 = vmul.u32 %v197_v54, %v173_v48  ;;  %v200_v61 = vmul.u32 %v198_v55, %v173_v48  ;;  %v201_v62 = vmul.u32 %v197_v54, %v174_v49  ;;  %v202_v2 = vmul.u32 %v198_v55, %v174_v49 }
  0x39   : > { %v177_v57 = vmul.u32 %v175_v52, %v173_v48  ;;  %v178_v58 = vmul.u32 %v176_v53, %v173_v48  ;;  %v179_v59 = vmul.u32 %v175_v52, %v174_v49  ;;  %v180_v63 = vmul.u32 %v176_v53, %v174_v49 }
  0x3a   : > { %v203_v3 = vshll.u32 %v200_v61, 16  ;;  %v205_v4 = vshll.u32 %v201_v62, 16  ;;  %v204_v17 = vshrl.u32 %v200_v61, 16  ;;  %v206_v24 = vshrl.u32 %v201_v62, 16 }
  0x3b   : > { %v181_v0 = vshll.u32 %v178_v58, 16  ;;  %v183_v1 = vshll.u32 %v179_v59, 16  ;;  %v182_v13 = vshrl.u32 %v178_v58, 16  ;;  %v184_v21 = vshrl.u32 %v179_v59, 16 }
  0x3c   : > { %vm207_vm6 = vc.u32 %v199_v60, %v203_v3  ;;  %v209_v12 = vadd.s32 %v203_v3, %v199_v60  ;;  %v118_v3 = vld [vmem:[#allocation2 + $0x2] sm:$0x1] }
  0x3d   : > { %vm185_vm5 = vc.u32 %v177_v57, %v181_v0  ;;  %v187_v6 = vadd.s32 %v181_v0, %v177_v57  ;;  %v208_v15 = vsel %vm207_vm6, 1, %v694_v9  ;;  %vm119_vm14 = vcmp.gt.f32.partialorder %v118_v3, 0.5 }
  0x3e   : > { %v186_v10 = vsel %vm185_vm5, 1, %v694_v9  ;;  %v210_v19 = vadd.s32 %v208_v15, %v202_v2  ;;  %vm211_vm8 = vc.u32 %v209_v12, %v205_v4  ;;  %v213_v27 = vadd.s32 %v209_v12, %v205_v4 }
  0x3f   : > { %v188_v14 = vadd.s32 %v186_v10, %v180_v63  ;;  %vm189_vm7 = vc.u32 %v187_v6, %v183_v1  ;;  %v212_v23 = vsel %vm211_vm8, 1, %v694_v9  ;;  %v433_v15 = vsel %vm119_vm14, 1, %v694_v9 }
  0x40   : > { %v190_v16 = vsel %vm189_vm7, 1, %v694_v9  ;;  %v214_v25 = vadd.s32 %v212_v23, %v210_v19  ;;  %vm267_vm5 = vweird.f32 %v760_v8 }
  0x41   : > { %v192_v22 = vadd.s32 %v190_v16, %v188_v14 }
  0x42   : > { %v215_v29 = vadd.s32 %v214_v25, %v204_v17 }
  0x43   : > { %v193_v26 = vadd.s32 %v192_v22, %v182_v13 }
  0x44   : > { %v216_v31 = vadd.s32 %v215_v29, %v206_v24 }
  0x45   : > { %v194_v30 = vadd.s32 %v193_v26, %v184_v21  ;;  %v434_v21 = vperm.slane %v433_v15, 0 }
  0x46   : > { %v220_v33 = vadd.s32 1, %v216_v31 }
  0x47   : > { %vm219_vm9 = vc.u32 %v194_v30, %v213_v27  ;;  %v218_v18 = vadd.s32 %v213_v27, %v194_v30  ;;  %vm435_vm6 = vcmp.eq.s32.totalorder %v434_v21, 1 }
  0x48   : > { %v221_v34 = vsel %vm219_vm9, %v220_v33, %v216_v31 }
  0x49   : > { %v222_v35 = vadd.s32 %v221_v34, %v217_v32 }
  0x4b   : > { %v223_v37 = vadd.s32 536870912, %v222_v35 }
  0x4d   : > { %v224_v38 = vshrl.u32 %v223_v37, 30 }
  0x4f   : > { %v225_v39 = vshll.u32 %v224_v38, 30  ;;  %v248_v56 = vsub.s32 4, %v224_v38 }
  0x51   : > { %v226_v40 = vsub.s32 %v222_v35, %v225_v39  ;;  %v249_v59 = vsel %vm126_vm12, %v248_v56, %v224_v38 }
  0x52   : > { %v251_v62 = vsel %vm125_vm13, 0, %v249_v59 }
  0x53   : > { %vm227_vm10 = vcmp.lt.s32.totalorder %v226_v40, 0  ;;  %v228_v41 = vsub.s32 0, %v226_v40  ;;  %v422_v4 = vadd.s32 3, %v251_v62  ;;  %v268_v10 = vand.u32 3, %v251_v62 }
  0x55   : > { %v229_v42 = vsel %vm227_vm10, %v228_v41, %v226_v40  ;;  %v423_v12 = vand.u32 3, %v422_v4  ;;  %vm273_vm15 = vcmp.eq.s32.totalorder %v268_v10, 2  ;;  %vm269_vm1 = vcmp.lt.s32.totalorder %v268_v10, 2 }
  0x56   : > { %v230_v43 = vclz %v229_v42  ;;  %vm270_vm2 = vcmp.eq.s32.totalorder %v268_v10, 0 }
  0x57   : > { %vm428_vm0 = vcmp.eq.s32.totalorder %v423_v12, 2  ;;  %vm425_vm3 = vcmp.eq.s32.totalorder %v423_v12, 0  ;;  %vm424_vm4 = vcmp.lt.s32.totalorder %v423_v12, 2 }
  0x58   : > { %v521_v44 = vadd.s32 4294967294, %v230_v43 }
  0x5a   : > { %vm522_vm11 = vcmp.lt.s32.totalorder %v521_v44, 0 }
  0x5b   : > { %v233_v45 = vsel %vm522_vm11, 0, %v521_v44 }
  0x5c   : > { %v234_v46 = vsub.s32 32, %v233_v45  ;;  %v235_v47 = vshll.u32 %v226_v40, %v233_v45  ;;  %v238_v48 = vsub.s32 4294967266, %v233_v45 }
  0x5e   : > { %v236_v36 = vshrl.u32 %v218_v18, %v234_v46  ;;  %v239_v49 = vadd.s32 127, %v238_v48 }
  0x60   : > { %v237_v50 = vor.u32 %v236_v36, %v235_v47  ;;  %v240_v51 = vshll.u32 %v239_v49, 23 }
  0x62   : > { %v241_v52 = vor.u32 4788187, %v240_v51  ;;  %v244_v53 = vcvt.s32.f32 %v237_v50 }
  0x64   : > { %v242_v54 = vand.u32 2147483647, %v241_v52 }
  0x66   : > { %v245_v55 = vmul.f32 %v244_v53, %v242_v54 }
  0x68   : > { %v246_v57 = vxor.u32 2147483648, %v245_v55 }
  0x6a   : > { %v247_v58 = vsel %vm126_vm12, %v246_v57, %v245_v55 }
  0x6b   : > { %v250_v60 = vsel %vm125_vm13, %v760_v8, %v247_v58 }
  0x6c   : > { %v252_v61 = vmul.f32 %v250_v60, %v250_v60 }
  0x6e   : > { %v253_v63 = vmul.f32 -0.001358992, %v252_v61  ;;  %v260_v0 = vmul.f32 -0.00019511016, %v252_v61 }
  0x70   : > { %v254_v1 = vadd.f32 0.041655596, %v253_v63  ;;  %v261_v2 = vadd.f32 0.008332121, %v260_v0 }
  0x72   : > { %v255_v5 = vmul.f32 %v254_v1, %v252_v61  ;;  %v262_v6 = vmul.f32 %v261_v2, %v252_v61 }
  0x74   : > { %v256_v11 = vadd.f32 -0.4999988, %v255_v5  ;;  %v263_v7 = vadd.f32 -0.16666654, %v262_v6 }
  0x76   : > { %v257_v13 = vmul.f32 %v256_v11, %v252_v61  ;;  %v264_v14 = vmul.f32 %v263_v7, %v252_v61 }
  0x78   : > { %v258_v16 = vadd.f32 1.0, %v257_v13  ;;  %v265_v17 = vadd.f32 1.0, %v264_v14 }
  0x7a   : > { %v266_v19 = vmul.f32 %v265_v17, %v250_v60  ;;  %v274_v20 = vxor.u32 2147483648, %v258_v16 }
  0x7c   : > { %v271_v22 = vxor.u32 2147483648, %v266_v19  ;;  %v275_v23 = vsel %vm273_vm15, %v274_v20, %v266_v19  ;;  %v430_v9 = vsel %vm428_vm0, %v274_v20, %v266_v19 }
  0x7e   : > { %v272_v24 = vsel %vm270_vm2, %v258_v16, %v271_v22  ;;  %v427_v25 = vsel %vm425_vm3, %v258_v16, %v271_v22 }
  0x7f   : > { %v276_v26 = vsel %vm269_vm1, %v272_v24, %v275_v23  ;;  %v431_v27 = vsel %vm424_vm4, %v427_v25, %v430_v9 }
  0x80   : > { %v277_v28 = vsel %vm267_vm5, nan, %v276_v26  ;;  %v432_v29 = vsel %vm267_vm5, nan, %v431_v27 }
  0x81   : > { %v436_v30 = vsel %vm435_vm6, %v277_v28, %v432_v29 }
  0x82   : > { %437 = vst [vmem:[%s109_s29] sm:$0xff] %v436_v30 }
  0x83   : > { %646 = shalt.err (!%p643_p7)
}
  0x84   : > { %534 = dma.vmem_to_hbm [thread:$0]  (%p743_p5), %s452_s30, 128, %s454_s2, %s439_s3  }
  0x85 PF: > { %p546_p8 = scmp.ge.s32.totalorder %s685_s9, 2  ;;  %s465_s19 = sand.u32 1, %s673_s6  }
  0x86   : > { %s466_s20 = scalar_lea.sflag [#allocation4], %s465_s19 }
  0x87   : > { %p541_p9 = pnand %p546_p8, %p747_p6 }
  0x89   : > { %p542_p10 = pneg %p541_p9 }
  0x8b   : > { %668 = dma.done.wait (%p542_p10), %s466_s20, 128  }
  0x8c   : > { %670 = vsyncadd (%p542_p10), %s466_s20, 4294967168  ;;  %p12_p11 = scmp.ge.s32.totalorder %s730_s12, 4   ;;  %s855_s6 = smov %s677_s7 }
  0x8d   : > { %s856_s7 = smov %s681_s8  ;;  %s857_s8 = smov %s741_s15 }
  0x8e   : > { %s858_s9 = smov %s730_s12  ;;  %14 = sbr.rel (!%p12_p11) target bundleno = 4 (0x4), region = 61 }
  0x93   :  { %472 = vsyncpa [#allocation3], 1 }
  0x94   :  { %474 = vsyncpa [#allocation3 + $0x1], 1 }
  0x95   :  { %475 = vsyncpa [#allocation4], 1 }
  0x96   :  { %477 = vsyncpa [#allocation4 + $0x1], 1 }

</bundles_post_ra>
